<compile_context>
chip_gen: v7x
topology: tpu7x:2x2x1
jax: 0.10.0
libtpu: 0.0.40
codegen_flags: <defaults>
</compile_context>

<pallas_src>
import functools

import jax
import jax.numpy as jnp
from jax import lax
from jax.experimental import pallas as pl
from jax.experimental.pallas import tpu as pltpu


def _round_up(x, m):
    return (x + m - 1) // m * m


def cart_head_kernel(seg_ref, tok_ref, emb_ref, w_ref, bias_ref, out_ref,
                     acc_ref, *, seq_len):
    """Fused (gather -> mean over L -> linear) for one (batch-tile, seq-tile).

    seg_ref:  (BT, BT*TL)     bf16  segment matrix: seg[b, j] = (j // TL == b)
    tok_ref:  (BT*TL, 1)      int32 flattened token ids of this tile
    emb_ref:  (V_pad, H_pad)  bf16  embedding table ("backbone reps"), resident
    w_ref:    (H_pad, NL_pad) bf16  classifier weight (transposed vs torch)
    bias_ref: (1, NL_pad)     f32   classifier bias
    out_ref:  (BT, NL_pad)    f32   lane-dense logits for this batch tile
    acc_ref:  (BT, H_pad)     f32   running sum of token representations
    """
    lt = pl.program_id(1)
    n_lt = pl.num_programs(1)

    @pl.when(lt == 0)
    def _():
        acc_ref[...] = jnp.zeros_like(acc_ref)

    m = tok_ref.shape[0]          # BT * TL
    v_pad = emb_ref.shape[0]

    # One-hot over the (padded) vocab, built directly in bf16 (VPU compare).
    tok = tok_ref[...]                                              # (M, 1)
    vocab_ids = lax.broadcasted_iota(jnp.int32, (m, v_pad), 1)      # (M, V_pad)
    onehot = (tok == vocab_ids).astype(jnp.bfloat16)                # (M, V_pad)

    # Per-batch-row token counts on the MXU (instead of an XLU sublane reduce):
    #   counts[b, v] = #{l in tile : tok[b, l] == v}
    # Exact: counts <= TL <= 256, which is exactly representable in bf16.
    counts = jnp.dot(seg_ref[...], onehot,
                     preferred_element_type=jnp.float32)            # (BT, V_pad)

    # Embedding gather / sum over this sequence tile as counts @ table (MXU).
    acc_ref[...] += jnp.dot(counts.astype(jnp.bfloat16), emb_ref[...],
                            preferred_element_type=jnp.float32)     # (BT, H_pad)

    @pl.when(lt == n_lt - 1)
    def _():
        pooled = (acc_ref[...] * (1.0 / seq_len)).astype(jnp.bfloat16)
        # Dropout(p=0.1) is identity in eval mode.
        # TODO(synk): training-mode stochastic dropout (pltpu.prng_random_bits).
        logits = jnp.dot(pooled, w_ref[...],
                         preferred_element_type=jnp.float32)        # (BT, NL_pad)
        out_ref[...] = logits + bias_ref[...]


def esm2_cart_forward(tokens, embed_table, w, b, *, seq_tile=256, batch_tile=128):
    """Forward: tokens (B, L) int32; embed_table (V, H); w (H, NL); b (NL,)."""
    B, L = tokens.shape
    V, H = embed_table.shape
    NL = w.shape[1]

    # --- Sequence tiling: TL <= 256 keeps per-tile bf16 counts exact. ---
    TL = min(L, seq_tile, 256)
    L_pad = _round_up(L, TL)
    n_lt = L_pad // TL

    # --- Batch tiling: batch the matmul M dim (>= 8 rows per grid step). ---
    if B <= batch_tile:
        BT = _round_up(B, 8)
        B_pad = BT
    else:
        BT = batch_tile
        B_pad = _round_up(B, BT)
    n_bt = B_pad // BT

    # --- Lane padding (128-dense). V gets one extra zero row used as the
    #     pad-token embedding so padded positions contribute exactly 0. ---
    PAD_ID = V
    V_pad = _round_up(V + 1, 128)
    H_pad = _round_up(H, 128)
    NL_pad = _round_up(NL, 128)

    # Padded, lane-dense parameter layouts (zero padding preserves the math).
    emb_p = jnp.zeros((V_pad, H_pad), jnp.bfloat16).at[:V, :H].set(
        embed_table.astype(jnp.bfloat16))
    w_p = jnp.zeros((H_pad, NL_pad), jnp.bfloat16).at[:H, :NL].set(
        w.astype(jnp.bfloat16))
    b_p = jnp.zeros((1, NL_pad), jnp.float32).at[0, :NL].set(
        b.reshape(NL).astype(jnp.float32))

    # Tokens: pad (batch -> B_pad, seq -> L_pad) with PAD_ID, then pre-flatten
    # each (BT, TL) tile into a column (wrapper-side layout plumbing) so the
    # kernel never reshapes across tile boundaries.
    tok_p = jnp.full((B_pad, L_pad), PAD_ID, dtype=jnp.int32)
    tok_p = tok_p.at[:B, :L].set(tokens.astype(jnp.int32))
    tok4 = (tok_p.reshape(n_bt, BT, n_lt, TL)
            .transpose(0, 2, 1, 3)
            .reshape(n_bt, n_lt, BT * TL, 1))

    # Static segment matrix for the MXU per-row counts reduction.
    seg = (jnp.arange(BT, dtype=jnp.int32)[:, None]
           == (jnp.arange(BT * TL, dtype=jnp.int32)[None, :] // TL)
           ).astype(jnp.bfloat16)

    # VMEM budget: double-buffered blocks + f32 accumulator + slack, floored at
    # 16 MiB and capped at 64 MiB (the smallest physical VMEM, v7x).
    invariant = emb_p.size * 2 + w_p.size * 2 + b_p.size * 4 + seg.size * 2
    per_step = BT * TL * 4 + BT * NL_pad * 4
    vmem_limit = int(min(max(2 * (invariant + per_step) + BT * H_pad * 4
                             + (8 << 20), 16 << 20), 64 << 20))

    cost = pl.CostEstimate(
        flops=int(2 * n_bt * n_lt * (BT * BT * TL * V_pad + BT * V_pad * H_pad)
                  + 2 * n_bt * BT * H_pad * NL_pad),
        transcendentals=0,
        bytes_accessed=int(tok4.size * 4 + emb_p.size * 2 + w_p.size * 2
                           + b_p.size * 4 + seg.size * 2 + B_pad * NL_pad * 4),
    )

    out_padded = pl.pallas_call(
        functools.partial(cart_head_kernel, seq_len=L),
        out_shape=jax.ShapeDtypeStruct((B_pad, NL_pad), jnp.float32),
        grid=(n_bt, n_lt),
        in_specs=[
            pl.BlockSpec((BT, BT * TL), lambda bi, li: (0, 0)),            # seg
            pl.BlockSpec((None, None, BT * TL, 1),
                         lambda bi, li: (bi, li, 0, 0)),                   # tokens
            pl.BlockSpec((V_pad, H_pad), lambda bi, li: (0, 0)),           # table
            pl.BlockSpec((H_pad, NL_pad), lambda bi, li: (0, 0)),          # weight
            pl.BlockSpec((1, NL_pad), lambda bi, li: (0, 0)),              # bias
        ],
        out_specs=pl.BlockSpec((BT, NL_pad), lambda bi, li: (bi, 0)),
        scratch_shapes=[pltpu.VMEM((BT, H_pad), jnp.float32)],
        compiler_params=pltpu.CompilerParams(
            dimension_semantics=("parallel", "arbitrary"),
            vmem_limit_bytes=vmem_limit,
        ),
        cost_estimate=cost,
    )(seg, tok4, emb_p, w_p, b_p)

    logits = out_padded[:B, :NL]
    # torch .squeeze(-1): squeeze only when num_labels == 1 (no-op otherwise).
    return logits[:, 0] if NL == 1 else logits


if __name__ == "__main__":
    # Small shapes consistent with the module: batch=2, seq=16, hidden=32,
    # num_labels=1, ESM-style vocab of 33 tokens.  seq_tile=8 (instead of the
    # default 256) forces a 2-step streaming accumulation over the sequence
    # axis so the init/accumulate/finalize path is exercised at this tiny L.
    B, L, H, NL, VOCAB = 2, 16, 32, 1, 33

    key = jax.random.PRNGKey(0)
    k_tok, k_emb, k_w, k_b = jax.random.split(key, 4)

    tokens = jax.random.randint(k_tok, (B, L), 0, VOCAB, dtype=jnp.int32)
    # Synthetic "backbone" final-layer representations = bf16 embedding lookup.
    # TODO(synk): the real pretrained ESM2 transformer backbone has no clean
    # in-script Pallas equivalent; replaced by this deterministic lookup.
    embed_table = (jax.random.normal(k_emb, (VOCAB, H), jnp.float32) * 0.02
                   ).astype(jnp.bfloat16)
    # nn.Linear(hidden_size, num_labels): torch weight is (NL, H); stored
    # transposed as (H, NL), the natural MXU layout.
    w = jax.random.normal(k_w, (H, NL), jnp.float32) * (1.0 / jnp.sqrt(H))
    b = jax.random.normal(k_b, (NL,), jnp.float32) * 0.01

    logits = esm2_cart_forward(tokens, embed_table, w, b, seq_tile=8)
    logits = jax.block_until_ready(logits)

    # Plain-JAX reference (eval-mode dropout == identity).
    reps = embed_table.astype(jnp.float32)[tokens]        # (B, L, H)
    ref = reps.mean(axis=1) @ w + b.reshape(1, NL)        # (B, NL)
    ref = ref[:, 0] if NL == 1 else ref

    assert logits.shape == ref.shape == (B,)
    assert jnp.allclose(logits, ref, atol=5e-3, rtol=5e-3), (logits, ref)

    print("KERNEL_OK")
</pallas_src>

<mosaic_0001>
module attributes {stable_mosaic.version = 11 : i64} {
  func.func @cart_head_kernel(%arg0: i32, %arg1: i32, %arg2: memref<8x64xbf16, #tpu.memory_space<vmem>>, %arg3: memref<1x1x64x1xi32, #tpu.memory_space<vmem>>, %arg4: memref<128x128xbf16, #tpu.memory_space<vmem>>, %arg5: memref<128x128xbf16, #tpu.memory_space<vmem>>, %arg6: memref<1x128xf32, #tpu.memory_space<vmem>>, %arg7: memref<8x128xf32, #tpu.memory_space<vmem>>, %arg8: memref<8x128xf32, #tpu.memory_space<vmem>>) attributes {dimension_semantics = [#tpu.dimension_semantics<parallel>, #tpu.dimension_semantics<arbitrary>], iteration_bounds = array<i64: 1, 2>, scalar_prefetch = 0 : i64, scratch_operands = 1 : i64, tpu.core_type = #tpu.core_type<tc>, window_params = [{pipeline_mode = #tpu.pipeline_mode<synchronous>, transform_indices = @transform_0, window_bounds = array<i64: 8, 64>}, {transform_indices = @transform_1, window_bounds = array<i64: 1, 1, 64, 1>}, {pipeline_mode = #tpu.pipeline_mode<synchronous>, transform_indices = @transform_2, window_bounds = array<i64: 128, 128>}, {pipeline_mode = #tpu.pipeline_mode<synchronous>, transform_indices = @transform_3, window_bounds = array<i64: 128, 128>}, {pipeline_mode = #tpu.pipeline_mode<synchronous>, transform_indices = @transform_4, window_bounds = array<i64: 1, 128>}, {transform_indices = @transform_5, window_bounds = array<i64: 8, 128>}]} {
    %c0_i32 = arith.constant 0 : i32
    %0 = arith.cmpi eq, %arg1, %c0_i32 : i32
    %1 = arith.extui %0 : i1 to i32
    %c0_i32_0 = arith.constant 0 : i32
    %2 = arith.cmpi ne, %1, %c0_i32_0 : i32
    scf.if %2 {
      %cst_14 = arith.constant 0.000000e+00 : f32
      %22 = vector.broadcast %cst_14 : f32 to vector<8x128xf32>
      %c0_15 = arith.constant 0 : index
      %c0_16 = arith.constant 0 : index
      %23 = vector.load %arg8[%c0_15, %c0_16] : memref<8x128xf32, #tpu.memory_space<vmem>>, vector<8x128xf32>
      tpu.vector_store %arg8[%c0_15, %c0_16], %22 {strides = array<i32>} : memref<8x128xf32, #tpu.memory_space<vmem>>, vector<8x128xf32>,
    } else {
    }
    %c0 = arith.constant 0 : index
    %c0_1 = arith.constant 0 : index
    %c0_2 = arith.constant 0 : index
    %c0_3 = arith.constant 0 : index
    %3 = vector.load %arg3[%c0, %c0_1, %c0_2, %c0_3] : memref<1x1x64x1xi32, #tpu.memory_space<vmem>>, vector<1x1x64x1xi32>
    %4 = vector.shape_cast %3 : vector<1x1x64x1xi32> to vector<64x1xi32>
    %5 = tpu.iota {dimensions = array<i32: 1>} : vector<64x128xi32>
    %6 = vector.broadcast %4 : vector<64x1xi32> to vector<64x128xi32>
    %7 = arith.cmpi eq, %6, %5 : vector<64x128xi32>
    %8 = arith.extui %7 : vector<64x128xi1> to vector<64x128xi32>
    %9 = arith.sitofp %8 : vector<64x128xi32> to vector<64x128xf32>
    %10 = arith.truncf %9 : vector<64x128xf32> to vector<64x128xbf16>
    %c0_4 = arith.constant 0 : index
    %c0_5 = arith.constant 0 : index
    %11 = vector.load %arg2[%c0_4, %c0_5] : memref<8x64xbf16, #tpu.memory_space<vmem>>, vector<8x64xbf16>
    %cst = arith.constant dense<0.000000e+00> : vector<8x128xf32>
    %12 = tpu.matmul %11, %10, %cst {dimension_numbers = #tpu.dot_dimension_numbers<[1], [0], [0], [1], [0, 0, 1, 1], [], []>} : vector<8x64xbf16>, vector<64x128xbf16>, vector<8x128xf32> -> vector<8x128xf32>
    %c0_6 = arith.constant 0 : index
    %c0_7 = arith.constant 0 : index
    %13 = vector.load %arg8[%c0_6, %c0_7] : memref<8x128xf32, #tpu.memory_space<vmem>>, vector<8x128xf32>
    %14 = arith.truncf %12 : vector<8x128xf32> to vector<8x128xbf16>
    %c0_8 = arith.constant 0 : index
    %c0_9 = arith.constant 0 : index
    %15 = vector.load %arg4[%c0_8, %c0_9] : memref<128x128xbf16, #tpu.memory_space<vmem>>, vector<128x128xbf16>
    %cst_10 = arith.constant dense<0.000000e+00> : vector<8x128xf32>
    %16 = tpu.matmul %14, %15, %cst_10 {dimension_numbers = #tpu.dot_dimension_numbers<[1], [0], [0], [1], [0, 0, 1, 1], [], []>} : vector<8x128xbf16>, vector<128x128xbf16>, vector<8x128xf32> -> vector<8x128xf32>
    %17 = arith.addf %13, %16 : vector<8x128xf32>
    %c0_11 = arith.constant 0 : index
    %c0_12 = arith.constant 0 : index
    %18 = vector.load %arg8[%c0_11, %c0_12] : memref<8x128xf32, #tpu.memory_space<vmem>>, vector<8x128xf32>
    tpu.vector_store %arg8[%c0_11, %c0_12], %17 {strides = array<i32>} : memref<8x128xf32, #tpu.memory_space<vmem>>, vector<8x128xf32>,
    %c1_i32 = arith.constant 1 : i32
    %19 = arith.cmpi eq, %arg1, %c1_i32 : i32
    %20 = arith.extui %19 : i1 to i32
    %c0_i32_13 = arith.constant 0 : i32
    %21 = arith.cmpi ne, %20, %c0_i32_13 : i32
    scf.if %21 {
      %c0_14 = arith.constant 0 : index
      %c0_15 = arith.constant 0 : index
      %22 = vector.load %arg8[%c0_14, %c0_15] : memref<8x128xf32, #tpu.memory_space<vmem>>, vector<8x128xf32>
      %cst_16 = arith.constant 6.250000e-02 : f32
      %23 = vector.broadcast %cst_16 : f32 to vector<8x128xf32>
      %24 = arith.mulf %22, %23 : vector<8x128xf32>
      %25 = arith.truncf %24 : vector<8x128xf32> to vector<8x128xbf16>
      %c0_17 = arith.constant 0 : index
      %c0_18 = arith.constant 0 : index
      %26 = vector.load %arg5[%c0_17, %c0_18] : memref<128x128xbf16, #tpu.memory_space<vmem>>, vector<128x128xbf16>
      %cst_19 = arith.constant dense<0.000000e+00> : vector<8x128xf32>
      %27 = tpu.matmul %25, %26, %cst_19 {dimension_numbers = #tpu.dot_dimension_numbers<[1], [0], [0], [1], [0, 0, 1, 1], [], []>} : vector<8x128xbf16>, vector<128x128xbf16>, vector<8x128xf32> -> vector<8x128xf32>
      %c0_20 = arith.constant 0 : index
      %c0_21 = arith.constant 0 : index
      %28 = vector.load %arg6[%c0_20, %c0_21] : memref<1x128xf32, #tpu.memory_space<vmem>>, vector<1x128xf32>
      %29 = vector.broadcast %28 : vector<1x128xf32> to vector<8x128xf32>
      %30 = arith.addf %27, %29 : vector<8x128xf32>
      %c0_22 = arith.constant 0 : index
      %c0_23 = arith.constant 0 : index
      %31 = vector.load %arg7[%c0_22, %c0_23] : memref<8x128xf32, #tpu.memory_space<vmem>>, vector<8x128xf32>
      tpu.vector_store %arg7[%c0_22, %c0_23], %30 {strides = array<i32>} : memref<8x128xf32, #tpu.memory_space<vmem>>, vector<8x128xf32>,
    } else {
    }
    return
  }
  func.func @transform_0(%arg0: i32, %arg1: i32) -> (i32, i32) {
    %c0_i32 = arith.constant 0 : i32
    %c0_i32_0 = arith.constant 0 : i32
    %c0_i32_1 = arith.constant 0 : i32
    return %c0_i32, %c0_i32_0 : i32, i32
  }
  func.func @transform_1(%arg0: i32, %arg1: i32) -> (i32, i32, i32, i32) {
    %c0_i32 = arith.constant 0 : i32
    %c0_i32_0 = arith.constant 0 : i32
    %c0_i32_1 = arith.constant 0 : i32
    return %arg0, %arg1, %c0_i32, %c0_i32_0 : i32, i32, i32, i32
  }
  func.func @transform_2(%arg0: i32, %arg1: i32) -> (i32, i32) {
    %c0_i32 = arith.constant 0 : i32
    %c0_i32_0 = arith.constant 0 : i32
    %c0_i32_1 = arith.constant 0 : i32
    return %c0_i32, %c0_i32_0 : i32, i32
  }
  func.func @transform_3(%arg0: i32, %arg1: i32) -> (i32, i32) {
    %c0_i32 = arith.constant 0 : i32
    %c0_i32_0 = arith.constant 0 : i32
    %c0_i32_1 = arith.constant 0 : i32
    return %c0_i32, %c0_i32_0 : i32, i32
  }
  func.func @transform_4(%arg0: i32, %arg1: i32) -> (i32, i32) {
    %c0_i32 = arith.constant 0 : i32
    %c0_i32_0 = arith.constant 0 : i32
    %c0_i32_1 = arith.constant 0 : i32
    return %c0_i32, %c0_i32_0 : i32, i32
  }
  func.func @transform_5(%arg0: i32, %arg1: i32) -> (i32, i32) {
    %c0_i32 = arith.constant 0 : i32
    %c0_i32_0 = arith.constant 0 : i32
    return %arg0, %c0_i32 : i32, i32
  }
}

</mosaic_0001>

<bundles_post_ra>
// kernel: tpu_custom_call.1
= control target key start
LH: loop header
LB: loop body
LE: loop exit
PB: predicated region body
PF: predicated region fallthrough
CT: control target
= control target key end

     0   :  { %10 = vsyncpa [#allocation4], 0  ;;  %s1147_s0 = inlined_call_operand.hbm [shape: bf16[8,64], index: 0, kind: input, shape index: {}]   ;;  %s1148_s1 = inlined_call_operand.vmem [shape: s32[1,2,64,1], index: 1, kind: input, shape index: {}]   ;;  %s1149_s2 = inlined_call_operand.vmem [shape: bf16[128,128], index: 2, kind: input, shape index: {}]   ;;  %s1150_s3 = inlined_call_operand.vmem [shape: bf16[128,128], index: 3, kind: input, shape index: {}]   ;;  %s1151_s4 = inlined_call_operand.vmem [shape: f32[1,128], index: 4, kind: input, shape index: {}]   ;;  %s1152_s5 = inlined_call_operand.hbm [shape: f32[8,128], index: 5, kind: output, shape index: {}]  }
   0x1   :  { %11 = vsyncpa [#allocation5], 0  ;;  %s991_s18 = smov 0   ;;  %s993_s19 = smov 0  }
   0x2   :  { %s995_s20 = smov 0  }
   0x3 LB: > { %s675_s21 = sadd.s32 4294967295, %s950_s20   ;;  %s26_s22 = sadd.s32 1, %s946_s19  ;;  %s950_s20 = sphi %s995_s20, %s17_s20   ;;  %s946_s19 = sphi %s993_s19, %s1163_s19   ;;  %s942_s18 = sphi %s991_s18, %s1162_s18  }
   0x4   : > { %p27_p0 = scmp.ge.s32.totalorder %s26_s22, 2  ;;  %p676_p1 = scmp.ge.s32.totalorder %s950_s20, 1 }
   0x5   : > { %p172_p2 = scmp.lt.s32.totalorder %s950_s20, 3  ;;  %p1018_p4 = scmp.eq.s32.totalorder %s675_s21, 0 }
   0x6   : > { %s1165_s22 = smov (%p27_p0, %s26_s22), 0  ;;  %s952_s25 = smov [#allocation3]  }
   0x7   : > { %p1012_p3 = pnand %p676_p1, %p172_p2  ;;  %s185_s26 = sshll.u32 %s952_s25, 4  ;;  %s186_s26 = int_to_ptr.vmem [resolvable:$true] %s185_s26 }
   0x8   : > { %s1157_s24 = scalar_select %p1018_p4, 1, 0 }
   0x9   : > { %s1156_s23 = scalar_select %p1012_p3, 1, 0 }
   0xa   : > { %p807_p5 = pneg %p1012_p3  ;;  %s866_s30 = scalar_lea.hbm %s1147_s0, 64 }
   0xb   : > { %p867_p7 = scmp.ne.s32.totalorder %s1147_s0, %s866_s30  ;;  %p873_p11 = scmp.lt.u32.totalorder %s866_s30, %s1147_s0 }
   0xc   : > { %p1026_p6 = pnand %p1018_p4, %p807_p5 }
   0xe   : > { %p868_p8 = pneg %p1026_p6 }
  0x10   : > { %p869_p9 = pnand %p868_p8, %p867_p7 }
  0x12   : > { %p870_p10 = pneg %p869_p9 }
  0x14   : > { %p875_p12 = pnand %p873_p11, %p870_p10 }
  0x16   : > { %878 = shalt.err (!%p875_p12)
}
  0x17   : > { %s879_s10 = scalar_lea.vmem %s186_s26, 64  ;;  %p887_p2 = scmp.lt.s32.totalorder %s186_s26, %s186_s26 }
  0x18   : > { %p880_p13 = scmp.ne.s32.totalorder %s186_s26, %s879_s10  ;;  %p888_p5 = scmp.lt.s32.totalorder %s879_s10, %s879_s10 }
  0x1a   : > { %p882_p0 = pnand %p880_p13, %p868_p8  ;;  %p889_p4 = por %p888_p5, %p887_p2 }
  0x1c   : > { %p883_p1 = pneg %p882_p0 }
  0x1e   : > { %p890_p3 = pnand %p889_p4, %p883_p1 }
  0x20   : > { %893 = shalt.err (!%p890_p3)
}
  0x21   : > { %810 = dma.hbm_to_vmem [thread:$0]  (!%p1026_p6), %s1147_s0, 64, %s186_s26, [#allocation4]  }
  0x22   : > { %p1159_p7 = scmp.ne.s32.totalorder %s1156_s23, 0 }
  0x23   : > { %p1160_p9 = scmp.ne.s32.totalorder (!%p1159_p7), %s1157_s24, 0 }
  0x24   : > { %219 = sbr.rel (%p1159_p7) target bundleno = 885 (0x375), region = 40 }
  0x2b   : > { %933 = dma.done.wait (%p1160_p9), [#allocation4], 64  }
  0x2c   : > { %935 = vsyncadd (%p1160_p9), [#allocation4], 4294967232  ;;  %p248_p8 = scmp.lt.s32.totalorder %s942_s18, 1  ;;  %p683_p3 = scmp.ne.s32.totalorder %s942_s18, 0 }
  0x2d   : > { %v953_v0 = vmov (!%p683_p3), 0.0  }
  0x2e   : > { %s249_s13 = scalar_select %p248_p8, %s942_s18, 1 }
  0x2f   : > { %259 = sbr.rel (%p683_p3) target bundleno = 54 (0x36), region = 48  ;;  %260 = vst [vmem:[#allocation2] sm:$0xff] (!%p683_p3), %v953_v0 }
  0x30   : > { %s723_s14 = sshll.u32 %s249_s13, 6 }
  0x31   : > { %s254_s17 = scalar_lea.vmem %s1148_s1, %s723_s14 }
  0x36 PF: > { %v263_v1 = vld [vmem:[%s254_s17 + $0x10] sm:$0xff]  ;;  %v261_v2 = vld [vmem:[%s254_s17] sm:$0xff]  ;;  %v954_v3 = vmov 0   ;;  %v264_v4 = vld [vmem:[%s254_s17 + $0x18] sm:$0xff]  ;;  %v955_v8 = vmov 0.0   ;;  %vm956_vm0 = vmmov 0   ;;  %v269_v18 = vlaneseq }
  0x37   : > { %849 = vset.pattern.permute.xlu1 %v954_v3  ;;  %848 = vset.pattern.permute.xlu0 %v954_v3  ;;  %v262_v5 = vld [vmem:[%s254_s17 + $0x8] sm:$0xff]  ;;  %v265_v7 = vld [vmem:[%s254_s17 + $0x20] sm:$0xff]  ;;  %v268_v9 = vld [vmem:[%s254_s17 + $0x38] sm:$0xff]  ;;  %v957_v24 = vmov 1.0|1.0   ;;  %vm324_vm13 = vcmask 523264  }
  0x38   : > { %278 = vperm.xlu1 %849, %v263_v1   ;;  %272 = vperm.xlu0 %848, %v261_v2   ;;  %v266_v6 = vld [vmem:[%s254_s17 + $0x28] sm:$0xff]  ;;  %v267_v10 = vld [vmem:[%s254_s17 + $0x30] sm:$0xff]  ;;  %v850_v11 = vld [vmem:[%s1149_s2] sm:$0xff]   ;;  %v270_v21 = vand.u32 127, %v269_v18  ;;  %p709_p4 = scmp.ne.s32.totalorder %s942_s18, 1 }
  0x39   : > { %747 = vmatprep.subr.bf16.mxu0 %v955_v8  ;;  %759 = vmatprep.subr.bf16.mxu1 %v955_v8  ;;  %v851_v12 = vld [vmem:[%s1149_s2 + $0x8] sm:$0xff]   ;;  %v852_v13 = vld [vmem:[%s1149_s2 + $0x10] sm:$0xff]   ;;  %v853_v14 = vld [vmem:[%s1149_s2 + $0x18] sm:$0xff]   ;;  %v958_v43 = vmov (!%p709_p4), 0.0   ;;  %vm959_vm14 = vmmov (!%p709_p4), 0  }
  0x3a   : > { %755 = vmatprep.mubr.msk.bf16.mxu0 %vm956_vm0, %v955_v8  ;;  %775 = vmatprep.mubr.msk.bf16.mxu1 %vm956_vm0, %v955_v8  ;;  %v854_v15 = vld [vmem:[%s1149_s2 + $0x20] sm:$0xff]   ;;  %v855_v16 = vld [vmem:[%s1149_s2 + $0x28] sm:$0xff]   ;;  %v856_v17 = vld [vmem:[%s1149_s2 + $0x30] sm:$0xff]  }
  0x3b   : > { %760 = vmatpush3.bf16.msra.mxu1 %v850_v11  ;;  %v323_v29 = vld [vmem:[#allocation3] sm:$0xf]  ;;  %v857_v30 = vld [vmem:[%s1149_s2 + $0x38] sm:$0xff]   ;;  %v368_v36 = vld [vmem:[#allocation2] sm:$0xff] }
  0x3c   : > { %281 = vperm.xlu1 %849, %v264_v4   ;;  %275 = vperm.xlu0 %848, %v262_v5   ;;  %v858_v42 = vld [vmem:[%s1150_s3] sm:$0xff] (!%p709_p4)   ;;  %v859_v44 = vld [vmem:[%s1150_s3 + $0x8] sm:$0xff] (!%p709_p4)   ;;  %v860_v45 = vld [vmem:[%s1150_s3 + $0x10] sm:$0xff] (!%p709_p4)  }
  0x3d   : > { %761 = vmatprep.subr.bf16.mxu1 %v955_v8  ;;  %v861_v46 = vld [vmem:[%s1150_s3 + $0x18] sm:$0xff] (!%p709_p4)   ;;  %v862_v47 = vld [vmem:[%s1150_s3 + $0x20] sm:$0xff] (!%p709_p4)   ;;  %v863_v48 = vld [vmem:[%s1150_s3 + $0x28] sm:$0xff] (!%p709_p4)  }
  0x3e   : > { %v864_v49 = vld [vmem:[%s1150_s3 + $0x30] sm:$0xff] (!%p709_p4)   ;;  %v865_v52 = vld [vmem:[%s1150_s3 + $0x38] sm:$0xff] (!%p709_p4)   ;;  %v710_v54 = vld [vmem:[%s1151_s4] ss:$0 sm:$0xff] (!%p709_p4) }
  0x3f   : > { %762 = vmatpush3.bf16.msra.mxu1 %v851_v12 }
  0x40   : > { %287 = vperm.xlu1 %849, %v266_v6   ;;  %284 = vperm.xlu0 %848, %v265_v7  }
  0x41   : > { %763 = vmatprep.subr.bf16.mxu1 %v955_v8 }
  0x43   : > { %764 = vmatpush3.bf16.msra.mxu1 %v852_v13 }
  0x44   : > { %293 = vperm.xlu1 %849, %v268_v9   ;;  %290 = vperm.xlu0 %848, %v267_v10  }
  0x45   : > { %765 = vmatprep.subr.bf16.mxu1 %v955_v8 }
  0x47   : > { %766 = vmatpush3.bf16.msra.mxu1 %v853_v14 }
  0x48   : > { %767 = vmatprep.subr.bf16.mxu1 %v955_v8 }
  0x4b   : > { %768 = vmatpush3.bf16.msra.mxu1 %v854_v15 }
  0x4c   : > { %769 = vmatprep.subr.bf16.mxu1 %v955_v8 }
  0x4f   : > { %770 = vmatpush3.bf16.msra.mxu1 %v855_v16 }
  0x50   : > { %771 = vmatprep.subr.bf16.mxu1 %v955_v8 }
  0x53   : > { %772 = vmatpush3.bf16.msra.mxu1 %v856_v17 }
  0x54   : > { %773 = vmatprep.subr.bf16.mxu1 %v955_v8 }
  0x57   : > { %774 = vmatpush3.bf16.msra.mxu1 %v857_v30 }
  0xb7   : > { %v279_v19 = vpop.permute.xlu1 %278  ;;  %v273_v20 = vpop.permute.xlu0 %272 }
  0xb8   : > { %vm295_vm2 = vcmp.eq.s32.totalorder %v273_v20, %v270_v21  ;;  %vm297_vm4 = vcmp.eq.s32.totalorder %v279_v19, %v270_v21 }
  0xbb   : > { %v282_v22 = vpop.permute.xlu1 %281  ;;  %v276_v23 = vpop.permute.xlu0 %275 }
  0xbc   : > { %vm296_vm1 = vcmp.eq.s32.totalorder %v276_v23, %v270_v21  ;;  %vm298_vm5 = vcmp.eq.s32.totalorder %v282_v22, %v270_v21 }
  0xbd   : > { %vm692_vm3 = vmpackc.low %vm296_vm1, %vm295_vm2 }
  0xbe   : > { %748 = vmatpush3.bf16.msk.msra.mxu0 %vm692_vm3, %v957_v24  ;;  %vm694_vm6 = vmpackc.low %vm298_vm5, %vm297_vm4 }
  0xbf   : > { %v288_v25 = vpop.permute.xlu1 %287  ;;  %v285_v26 = vpop.permute.xlu0 %284  ;;  %749 = vmatprep.subr.bf16.mxu0 %v955_v8 }
  0xc0   : > { %vm300_vm7 = vcmp.eq.s32.totalorder %v288_v25, %v270_v21  ;;  %vm299_vm8 = vcmp.eq.s32.totalorder %v285_v26, %v270_v21 }
  0xc1   : > { %vm696_vm9 = vmpackc.low %vm300_vm7, %vm299_vm8 }
  0xc2   : > { %750 = vmatpush3.bf16.msk.msra.mxu0 %vm694_vm6, %v957_v24 }
  0xc3   : > { %v294_v27 = vpop.permute.xlu1 %293  ;;  %v291_v28 = vpop.permute.xlu0 %290  ;;  %751 = vmatprep.subr.bf16.mxu0 %v955_v8 }
  0xc4   : > { %vm302_vm10 = vcmp.eq.s32.totalorder %v294_v27, %v270_v21  ;;  %vm301_vm11 = vcmp.eq.s32.totalorder %v291_v28, %v270_v21 }
  0xc5   : > { %vm698_vm12 = vmpackc.low %vm302_vm10, %vm301_vm11 }
  0xc6   : > { %752 = vmatpush3.bf16.msk.msra.mxu0 %vm696_vm9, %v957_v24 }
  0xc7   : > { %753 = vmatprep.subr.bf16.mxu0 %v955_v8 }
  0xca   : > { %754 = vmatpush3.bf16.msk.msra.mxu0 %vm698_vm12, %v957_v24 }
  0xcb   : > { %779 = vmatprep.subr.bf16.mxu0 (!%p709_p4), %v958_v43 }
  0xcd   : > { %756 = vmatmul.mubr.msk.bf16.vlgmr.msra.gmra.mrb[0].mxu0 %vm324_vm13, %v323_v29 }
  0xce   : > { %780 = vmatpush3.bf16.msra.mxu0 (!%p709_p4), %v858_v42  ;;  %795 = vmatprep.mubr.msk.bf16.mxu0 (!%p709_p4), %vm959_vm14, %v958_v43 }
  0xcf   : > { %781 = vmatprep.subr.bf16.mxu0 (!%p709_p4), %v958_v43 }
  0xd2   : > { %782 = vmatpush3.bf16.msra.mxu0 (!%p709_p4), %v859_v44 }
  0xd3   : > { %783 = vmatprep.subr.bf16.mxu0 (!%p709_p4), %v958_v43 }
  0xd6   : > { %784 = vmatpush3.bf16.msra.mxu0 (!%p709_p4), %v860_v45 }
  0xd7   : > { %785 = vmatprep.subr.bf16.mxu0 (!%p709_p4), %v958_v43 }
  0xda   : > { %786 = vmatpush3.bf16.msra.mxu0 (!%p709_p4), %v861_v46 }
  0xdb   : > { %787 = vmatprep.subr.bf16.mxu0 (!%p709_p4), %v958_v43 }
  0xde   : > { %788 = vmatpush3.bf16.msra.mxu0 (!%p709_p4), %v862_v47 }
  0xdf   : > { %789 = vmatprep.subr.bf16.mxu0 (!%p709_p4), %v958_v43 }
  0xe2   : > { %790 = vmatpush3.bf16.msra.mxu0 (!%p709_p4), %v863_v48 }
  0xe3   : > { %791 = vmatprep.subr.bf16.mxu0 (!%p709_p4), %v958_v43 }
  0xe6   : > { %792 = vmatpush3.bf16.msra.mxu0 (!%p709_p4), %v864_v49 }
  0xe7   : > { %793 = vmatprep.subr.bf16.mxu0 (!%p709_p4), %v958_v43 }
  0xea   : > { %794 = vmatpush3.bf16.msra.mxu0 (!%p709_p4), %v865_v52 }
 0x1a0   : > { %v362_v31 = vpop.f32.mrb[0].mxu0 }
 0x1a1   : > { %v369_v32 = vpack.c.bf16 %v362_v31, %v362_v31  ;;  %v757_v33 = vpop.f32.mrb[1].mxu0 }
 0x1a2   : > { %v365_v34 = vpop.f32.mrb[2].mxu0 }
 0x1a3   : > { %v758_v35 = vpop.f32.mrb[3].mxu0  ;;  %776 = vmatmul.mubr.bf16.vlgmr.msra.gmra.mrb[0].mxu1 %v369_v32 }
 0x273   : > { %479 = sbr.rel (%p709_p4) target bundleno = 860 (0x35c), region = 52 }
 0x276   : > { %v468_v37 = vpop.f32.mrb[0].mxu1 }
 0x277   : > { %v474_v38 = vadd.f32 %v468_v37, %v368_v36  ;;  %v777_v39 = vpop.f32.mrb[1].mxu1 }
 0x278   : > { %v471_v40 = vpop.f32.mrb[2].mxu1 }
 0x279   : > { %475 = vst [vmem:[#allocation2] sm:$0xff] %v474_v38  ;;  %v778_v41 = vpop.f32.mrb[3].mxu1 }
 0x280   : > { %v480_v50 = vld [vmem:[#allocation2] sm:$0xff] }
 0x281   : > { %v481_v51 = vmul.f32 0.0625, %v480_v50 }
 0x283   : > { %v482_v53 = vpack.c.bf16 %v481_v51, %v481_v51 }
 0x285   : > { %796 = vmatmul.mubr.bf16.vlgmr.msra.gmra.mrb[0].mxu0 %v482_v53 }
 0x358   : > { %v588_v55 = vpop.f32.mrb[0].mxu0 }
 0x359   : > { %v589_v56 = vadd.f32 %v710_v54, %v588_v55  ;;  %v797_v57 = vpop.f32.mrb[1].mxu0 }
 0x35a   : > { %v591_v58 = vpop.f32.mrb[2].mxu0 }
 0x35b   : > { %594 = vst [vmem:[#allocation6] sm:$0xff] %v589_v56  ;;  %v798_v59 = vpop.f32.mrb[3].mxu0 }
 0x35c PF: > { %p1112_p6 = scmp.eq.s32.totalorder %s675_s21, 1  ;;  %s960_s12 = smov [#allocation6]  }
 0x35d   : > { %s604_s13 = sshll.u32 %s960_s12, 4  ;;  %s605_s13 = int_to_ptr.vmem [resolvable:$true] %s604_s13 }
 0x35e   : > { %s894_s14 = scalar_lea.vmem %s605_s13, 128  ;;  %p901_p13 = scmp.lt.s32.totalorder %s605_s13, %s605_s13 }
 0x35f   : > { %p895_p10 = scmp.ne.s32.totalorder %s605_s13, %s894_s14  ;;  %p902_p0 = scmp.lt.s32.totalorder %s894_s14, %s894_s14 }
 0x361   : > { %p896_p11 = pnand %p895_p10, %p1112_p6  ;;  %p903_p1 = por %p902_p0, %p901_p13 }
 0x363   : > { %p897_p12 = pneg %p896_p11 }
 0x365   : > { %p904_p2 = pnand %p903_p1, %p897_p12 }
 0x367   : > { %907 = shalt.err (!%p904_p2)
}
 0x368   : > { %s908_s21 = scalar_lea.hbm %s1152_s5, 128 }
 0x369   : > { %p909_p5 = scmp.ne.s32.totalorder %s1152_s5, %s908_s21  ;;  %p914_p8 = scmp.lt.u32.totalorder %s908_s21, %s1152_s5 }
 0x36b   : > { %p910_p7 = pnand %p909_p5, %p1112_p6 }
 0x36d   : > { %p911_p9 = pneg %p910_p7 }
 0x36f   : > { %p916_p3 = pnand %p914_p8, %p911_p9 }
 0x371   : > { %919 = shalt.err (!%p916_p3)
}
 0x372   : > { %804 = dma.vmem_to_hbm [thread:$0]  (%p1112_p6), %s605_s13, 128, %s1152_s5, [#allocation5]  }
 0x373   : > { %937 = dma.done.wait (%p1112_p6), [#allocation5], 128  }
 0x374   : > { %939 = vsyncadd (%p1112_p6), [#allocation5], 4294967168 }
 0x375 PF: > { %s17_s20 = sadd.s32 1, %s950_s20   ;;  %s1162_s18 = smov %s946_s19 }
 0x376   : > { %p14_p4 = scmp.ge.s32.totalorder %s17_s20, 4   ;;  %s1163_s19 = smov %s1165_s22 }
 0x378   :  { %16 = sbr.rel (!%p14_p4) target bundleno = 3 (0x3), region = 81 }
 0x37f   :  { %617 = vsyncpa [#allocation4], 1 }
 0x380   :  { %619 = vsyncpa [#allocation4 + $0x1], 1 }
 0x381   :  { %620 = vsyncpa [#allocation5], 1 }
 0x382   :  { %622 = vsyncpa [#allocation5 + $0x1], 1 }

</bundles_post_ra>
